<compile_context>
chip_gen: v7x
topology: tpu7x:2x2x1
jax: 0.10.0
libtpu: 0.0.40
codegen_flags: <defaults>
</compile_context>

<pallas_src>
import functools

import jax
import jax.numpy as jnp
import numpy as np
from jax import lax
from jax.experimental import pallas as pl
from jax.experimental.pallas import tpu as pltpu


def _ru(x, m):
    return -(-int(x) // int(m)) * int(m)


def _padded_bytes(shape, dtype):
    """VMEM footprint of a buffer including (sublane, lane) tile padding."""
    itemsize = np.dtype(dtype).itemsize
    sub = 8 * (4 // itemsize)
    *lead, s, l = shape
    lead_n = int(np.prod(lead, dtype=np.int64)) if lead else 1
    return lead_n * _ru(s, sub) * _ru(l, 128) * itemsize


def _vmem_capacity_bytes():
    # Generation-aware: ~128 MiB on v5e/v6e, 64 MiB per TensorCore on v7x.
    try:
        return int(pltpu.get_tpu_info().vmem_capacity_bytes)
    except Exception:
        return 64 * 2 ** 20          # conservative fallback (v7x per-TC VMEM)


def _step_vmem_bytes(TH, *, W, K, Cin, Cout, out_dtype):
    pad = (K - 1) // 2
    Wp = W + 2 * pad
    THp = TH + 2 * pad
    S_in = _ru(THp * Wp + K - 1, 128)
    KKC = K * K * Cin
    return (2 * _padded_bytes((1, 1, Cin, S_in), jnp.bfloat16)      # input windows (dbl buf)
            + 2 * _padded_bytes((Cout, KKC), jnp.bfloat16)          # weights
            + 2 * _padded_bytes((Cout, 1), jnp.float32)             # bias
            + 2 * _padded_bytes((1, Cout, TH, W), out_dtype)        # output blocks
            + _padded_bytes((KKC, TH * Wp), jnp.bfloat16)           # im2col slab scratch
            + _padded_bytes((Cout, TH * Wp), out_dtype)             # result scratch
            + (2 << 20))                                            # headroom


def _pick_tile_h(H, W, K, Cin, Cout, out_dtype, vmem_budget):
    """Largest H-tile (multiple of 8, capped at 64 or the whole height) whose per-step
    working set fits the budget: bigger tiles amortize the ~0.35us/step overhead and
    shrink the (K-1)/TH halo duplication of the input windows."""
    h8 = _ru(max(H, 1), 8)
    cands = [c for c in (8, 16, 32, 64) if c < h8]
    if h8 <= 64:
        cands.append(h8)
    cands = sorted(set(cands)) or [8]
    best = cands[0]
    for th in cands:
        if _step_vmem_bytes(th, W=W, K=K, Cin=Cin, Cout=Cout,
                            out_dtype=out_dtype) <= vmem_budget:
            best = th
    return best


def _conv_relu_kernel(x_ref, w_ref, b_ref, o_ref, slab_ref, res_ref, *,
                      K, TH, W, Wp, Cin):
    # x_ref:    (1, 1, Cin, S_in)   flattened, padded NCHW halo window (bf16)
    # w_ref:    (Cout, K*K*Cin)     weights, rows ordered (kh, kw, cin) (bf16)
    # b_ref:    (Cout, 1)           bias (f32)
    # o_ref:    (1, Cout, TH, W)    output tile (already NCHW layout)
    # slab_ref: (K*K*Cin, TH*Wp)    im2col slab scratch (bf16)
    # res_ref:  (Cout, TH*Wp)       matmul result scratch (output dtype)
    S = TH * Wp
    # im2col build: each tap of the flattened window is ONE contiguous lane slice,
    # stored as full-lane-width rows of the slab (no reshape, no masked column store).
    for kh in range(K):
        for kw in range(K):
            start = kh * Wp + kw
            r0 = (kh * K + kw) * Cin
            slab_ref[r0:r0 + Cin, :] = x_ref[0, 0, :, start:start + S]

    # Single MXU matmul, f32 accumulation, lane-dense N dim (= TH*Wp); fused bias+ReLU.
    acc = jnp.dot(w_ref[...], slab_ref[...], preferred_element_type=jnp.float32)
    acc = jnp.maximum(acc + b_ref[...], 0.0)
    res_ref[...] = acc.astype(res_ref.dtype)

    # Drop the (Wp - W) junk columns per output row (cheap in-VMEM compaction).
    for th in range(TH):
        o_ref[0, :, th, :] = res_ref[:, th * Wp:th * Wp + W]


def conv_unit_forward(x_nchw, weight_oihw, bias, *, stride=1, tile_h=None, out_dtype=None):
    """ConvUnit forward: conv2d('same' padding) + bias + ReLU.

    x_nchw:      (N, Cin, H, W)      float32
    weight_oihw: (Cout, Cin, K, K)   float32  (PyTorch layout)
    bias:        (Cout,)             float32
    returns:     (N, Cout, H, W)     out_dtype (defaults to x dtype)

    Note: MXU operands are bf16 with f32 accumulation; bit-exact f32 parity with a
    pure-f32 PyTorch ConvUnit is not expected (differences are ~bf16 rounding level).
    """
    # TODO(synk): the bn=True (BatchNorm) branch of ConvUnit and stride > 1 are not
    #             implemented (MCNN's ConvUnit uses stride=1, bn=False).
    assert stride == 1
    N, Cin, H, W = x_nchw.shape
    Cout, Cin_w, K, K2 = weight_oihw.shape
    assert Cin == Cin_w and K == K2
    assert K % 2 == 1, "only odd K gives 'same' output with (K-1)//2 padding"
    pad = (K - 1) // 2
    out_dtype = x_nchw.dtype if out_dtype is None else jnp.dtype(out_dtype)

    # Pad Cin to an even count so bf16 sublane-pair aligned slab stores are guaranteed
    # (matters for the Cin=1 / Cin=3 first layers; zero channels contribute nothing).
    Cin_p = _ru(Cin, 2)

    vmem_cap = _vmem_capacity_bytes()
    if tile_h is None:
        TH = _pick_tile_h(H, W, K, Cin_p, Cout, out_dtype, int(0.45 * vmem_cap))
    else:
        TH = int(tile_h)
        assert TH % 8 == 0, "tile_h must be a multiple of 8"
    n_h = int(pl.cdiv(H, TH))
    H_pad = n_h * TH
    Wp = W + 2 * pad
    THp = TH + 2 * pad
    KKC = K * K * Cin_p
    S_in = _ru(THp * Wp + (K - 1), 128)   # flattened window length (+ slack for last tap)

    # ---- wrapper prep: ONE pass over the input (cast + pad + halo windows + flatten).
    # TODO(synk): replace the (K-1)/TH window duplication with pl.Element halo indexing
    #             or a manual make_async_copy halo DMA straight from the raw NCHW buffer.
    x_p = jnp.pad(x_nchw.astype(jnp.bfloat16),
                  ((0, 0), (0, Cin_p - Cin), (pad, pad + (H_pad - H)), (pad, pad)))
    if n_h == 1:
        x_win = x_p[:, None]
    else:
        x_win = jnp.stack([x_p[:, :, i * TH:i * TH + THp, :] for i in range(n_h)], axis=1)
    x_flat = x_win.reshape(N, n_h, Cin_p, THp * Wp)
    x_flat = jnp.pad(x_flat, ((0, 0), (0, 0), (0, 0), (0, S_in - THp * Wp)))

    # Weight rows ordered (kh, kw, cin) to match the slab; bias as a (Cout, 1) column.
    w_p = jnp.pad(weight_oihw, ((0, 0), (0, Cin_p - Cin), (0, 0), (0, 0)))
    w_mat = jnp.transpose(w_p, (0, 2, 3, 1)).reshape(Cout, KKC).astype(jnp.bfloat16)
    b2d = bias.reshape(Cout, 1).astype(jnp.float32)

    vmem_est = _step_vmem_bytes(TH, W=W, K=K, Cin=Cin_p, Cout=Cout, out_dtype=out_dtype)
    vmem_limit = int(min(0.85 * vmem_cap, max(32 * 2 ** 20, vmem_est + (8 << 20))))

    out = pl.pallas_call(
        functools.partial(_conv_relu_kernel, K=K, TH=TH, W=W, Wp=Wp, Cin=Cin_p),
        out_shape=jax.ShapeDtypeStruct((N, Cout, H_pad, W), out_dtype),
        grid=(N, n_h),
        in_specs=[
            pl.BlockSpec((1, 1, Cin_p, S_in), lambda b, h: (b, h, 0, 0)),
            pl.BlockSpec((Cout, KKC), lambda b, h: (0, 0)),
            pl.BlockSpec((Cout, 1), lambda b, h: (0, 0)),
        ],
        out_specs=pl.BlockSpec((1, Cout, TH, W), lambda b, h: (b, 0, h, 0)),
        scratch_shapes=[pltpu.VMEM((KKC, TH * Wp), jnp.bfloat16),
                        pltpu.VMEM((Cout, TH * Wp), out_dtype)],
        compiler_params=pltpu.CompilerParams(
            dimension_semantics=("parallel", "parallel"),
            vmem_limit_bytes=vmem_limit),
        cost_estimate=pl.CostEstimate(
            flops=2 * N * H_pad * W * K * K * Cin_p * Cout,
            transcendentals=0,
            bytes_accessed=int(x_flat.size * 2 + w_mat.size * 2 + b2d.size * 4
                               + N * Cout * H_pad * W * np.dtype(out_dtype).itemsize)),
    )(x_flat, w_mat, b2d)

    if H_pad != H:
        out = out[:, :, :H, :]
    return out


if __name__ == "__main__":
    # Shapes consistent with ConvUnit(in_channels=4, out_channels=8, kernel_size=3)
    N, Cin, H, W = 2, 4, 16, 16
    Cout, K = 8, 3

    key = jax.random.PRNGKey(0)
    kx, kw, kb = jax.random.split(key, 3)
    x = jax.random.normal(kx, (N, Cin, H, W), dtype=jnp.float32)
    fan_in = Cin * K * K
    bound = 1.0 / np.sqrt(fan_in)
    weight = jax.random.uniform(kw, (Cout, Cin, K, K), dtype=jnp.float32,
                                minval=-bound, maxval=bound)
    bias = jax.random.uniform(kb, (Cout,), dtype=jnp.float32,
                              minval=-bound, maxval=bound)

    # tile_h=8 exercises the halo-tiled path: grid=(2, 2).
    out = conv_unit_forward(x, weight, bias, tile_h=8)
    out = jax.block_until_ready(out)

    # Reference: f32 conv on the same bf16-rounded operands (kernel uses bf16 operands
    # with f32 accumulation).
    xb = x.astype(jnp.bfloat16).astype(jnp.float32)
    wb = weight.astype(jnp.bfloat16).astype(jnp.float32)
    ref = lax.conv_general_dilated(
        xb, wb, window_strides=(1, 1),
        padding=[((K - 1) // 2, (K - 1) // 2)] * 2,
        dimension_numbers=("NCHW", "OIHW", "NCHW"),
        precision=lax.Precision.HIGHEST)
    ref = jnp.maximum(ref + bias[None, :, None, None], 0.0)

    np.testing.assert_allclose(np.asarray(out), np.asarray(ref), atol=1e-2, rtol=1e-2)
    print("KERNEL_OK")
</pallas_src>

<mosaic_0001>
module attributes {stable_mosaic.version = 11 : i64} {
  func.func @_conv_relu_kernel(%arg0: i32, %arg1: i32, %arg2: memref<1x1x4x256xbf16, #tpu.memory_space<vmem>>, %arg3: memref<8x36xbf16, #tpu.memory_space<vmem>>, %arg4: memref<8x1xf32, #tpu.memory_space<vmem>>, %arg5: memref<1x8x8x16xf32, #tpu.memory_space<vmem>>, %arg6: memref<36x144xbf16, #tpu.memory_space<vmem>>, %arg7: memref<8x144xf32, #tpu.memory_space<vmem>>) attributes {dimension_semantics = [#tpu.dimension_semantics<parallel>, #tpu.dimension_semantics<parallel>], iteration_bounds = array<i64: 2, 2>, scalar_prefetch = 0 : i64, scratch_operands = 2 : i64, tpu.core_type = #tpu.core_type<tc>, window_params = [{transform_indices = @transform_0, window_bounds = array<i64: 1, 1, 4, 256>}, {pipeline_mode = #tpu.pipeline_mode<synchronous>, transform_indices = @transform_1, window_bounds = array<i64: 8, 36>}, {pipeline_mode = #tpu.pipeline_mode<synchronous>, transform_indices = @transform_2, window_bounds = array<i64: 8, 1>}, {transform_indices = @transform_3, window_bounds = array<i64: 1, 8, 8, 16>}]} {
    %c0 = arith.constant 0 : index
    %c0_0 = arith.constant 0 : index
    %c0_1 = arith.constant 0 : index
    %c0_2 = arith.constant 0 : index
    %0 = vector.load %arg2[%c0, %c0_0, %c0_1, %c0_2] : memref<1x1x4x256xbf16, #tpu.memory_space<vmem>>, vector<1x1x4x144xbf16>
    %1 = vector.shape_cast %0 : vector<1x1x4x144xbf16> to vector<4x144xbf16>
    %c0_3 = arith.constant 0 : index
    %c0_4 = arith.constant 0 : index
    %2 = vector.load %arg6[%c0_3, %c0_4] : memref<36x144xbf16, #tpu.memory_space<vmem>>, vector<4x144xbf16>
    tpu.vector_store %arg6[%c0_3, %c0_4], %1 {strides = array<i32>} : memref<36x144xbf16, #tpu.memory_space<vmem>>, vector<4x144xbf16>,
    %c0_5 = arith.constant 0 : index
    %c0_6 = arith.constant 0 : index
    %c0_7 = arith.constant 0 : index
    %c1 = arith.constant 1 : index
    %3 = vector.load %arg2[%c0_5, %c0_6, %c0_7, %c1] : memref<1x1x4x256xbf16, #tpu.memory_space<vmem>>, vector<1x1x4x144xbf16>
    %4 = vector.shape_cast %3 : vector<1x1x4x144xbf16> to vector<4x144xbf16>
    %c4 = arith.constant 4 : index
    %c0_8 = arith.constant 0 : index
    %5 = vector.load %arg6[%c4, %c0_8] : memref<36x144xbf16, #tpu.memory_space<vmem>>, vector<4x144xbf16>
    tpu.vector_store %arg6[%c4, %c0_8], %4 {strides = array<i32>} : memref<36x144xbf16, #tpu.memory_space<vmem>>, vector<4x144xbf16>,
    %c0_9 = arith.constant 0 : index
    %c0_10 = arith.constant 0 : index
    %c0_11 = arith.constant 0 : index
    %c2 = arith.constant 2 : index
    %6 = vector.load %arg2[%c0_9, %c0_10, %c0_11, %c2] : memref<1x1x4x256xbf16, #tpu.memory_space<vmem>>, vector<1x1x4x144xbf16>
    %7 = vector.shape_cast %6 : vector<1x1x4x144xbf16> to vector<4x144xbf16>
    %c8 = arith.constant 8 : index
    %c0_12 = arith.constant 0 : index
    %8 = vector.load %arg6[%c8, %c0_12] : memref<36x144xbf16, #tpu.memory_space<vmem>>, vector<4x144xbf16>
    tpu.vector_store %arg6[%c8, %c0_12], %7 {strides = array<i32>} : memref<36x144xbf16, #tpu.memory_space<vmem>>, vector<4x144xbf16>,
    %c0_13 = arith.constant 0 : index
    %c0_14 = arith.constant 0 : index
    %c0_15 = arith.constant 0 : index
    %c18 = arith.constant 18 : index
    %9 = vector.load %arg2[%c0_13, %c0_14, %c0_15, %c18] : memref<1x1x4x256xbf16, #tpu.memory_space<vmem>>, vector<1x1x4x144xbf16>
    %10 = vector.shape_cast %9 : vector<1x1x4x144xbf16> to vector<4x144xbf16>
    %c12 = arith.constant 12 : index
    %c0_16 = arith.constant 0 : index
    %11 = vector.load %arg6[%c12, %c0_16] : memref<36x144xbf16, #tpu.memory_space<vmem>>, vector<4x144xbf16>
    tpu.vector_store %arg6[%c12, %c0_16], %10 {strides = array<i32>} : memref<36x144xbf16, #tpu.memory_space<vmem>>, vector<4x144xbf16>,
    %c0_17 = arith.constant 0 : index
    %c0_18 = arith.constant 0 : index
    %c0_19 = arith.constant 0 : index
    %c19 = arith.constant 19 : index
    %12 = vector.load %arg2[%c0_17, %c0_18, %c0_19, %c19] : memref<1x1x4x256xbf16, #tpu.memory_space<vmem>>, vector<1x1x4x144xbf16>
    %13 = vector.shape_cast %12 : vector<1x1x4x144xbf16> to vector<4x144xbf16>
    %c16 = arith.constant 16 : index
    %c0_20 = arith.constant 0 : index
    %14 = vector.load %arg6[%c16, %c0_20] : memref<36x144xbf16, #tpu.memory_space<vmem>>, vector<4x144xbf16>
    tpu.vector_store %arg6[%c16, %c0_20], %13 {strides = array<i32>} : memref<36x144xbf16, #tpu.memory_space<vmem>>, vector<4x144xbf16>,
    %c0_21 = arith.constant 0 : index
    %c0_22 = arith.constant 0 : index
    %c0_23 = arith.constant 0 : index
    %c20 = arith.constant 20 : index
    %15 = vector.load %arg2[%c0_21, %c0_22, %c0_23, %c20] : memref<1x1x4x256xbf16, #tpu.memory_space<vmem>>, vector<1x1x4x144xbf16>
    %16 = vector.shape_cast %15 : vector<1x1x4x144xbf16> to vector<4x144xbf16>
    %c20_24 = arith.constant 20 : index
    %c0_25 = arith.constant 0 : index
    %17 = vector.load %arg6[%c20_24, %c0_25] : memref<36x144xbf16, #tpu.memory_space<vmem>>, vector<4x144xbf16>
    tpu.vector_store %arg6[%c20_24, %c0_25], %16 {strides = array<i32>} : memref<36x144xbf16, #tpu.memory_space<vmem>>, vector<4x144xbf16>,
    %c0_26 = arith.constant 0 : index
    %c0_27 = arith.constant 0 : index
    %c0_28 = arith.constant 0 : index
    %c36 = arith.constant 36 : index
    %18 = vector.load %arg2[%c0_26, %c0_27, %c0_28, %c36] : memref<1x1x4x256xbf16, #tpu.memory_space<vmem>>, vector<1x1x4x144xbf16>
    %19 = vector.shape_cast %18 : vector<1x1x4x144xbf16> to vector<4x144xbf16>
    %c24 = arith.constant 24 : index
    %c0_29 = arith.constant 0 : index
    %20 = vector.load %arg6[%c24, %c0_29] : memref<36x144xbf16, #tpu.memory_space<vmem>>, vector<4x144xbf16>
    tpu.vector_store %arg6[%c24, %c0_29], %19 {strides = array<i32>} : memref<36x144xbf16, #tpu.memory_space<vmem>>, vector<4x144xbf16>,
    %c0_30 = arith.constant 0 : index
    %c0_31 = arith.constant 0 : index
    %c0_32 = arith.constant 0 : index
    %c37 = arith.constant 37 : index
    %21 = vector.load %arg2[%c0_30, %c0_31, %c0_32, %c37] : memref<1x1x4x256xbf16, #tpu.memory_space<vmem>>, vector<1x1x4x144xbf16>
    %22 = vector.shape_cast %21 : vector<1x1x4x144xbf16> to vector<4x144xbf16>
    %c28 = arith.constant 28 : index
    %c0_33 = arith.constant 0 : index
    %23 = vector.load %arg6[%c28, %c0_33] : memref<36x144xbf16, #tpu.memory_space<vmem>>, vector<4x144xbf16>
    tpu.vector_store %arg6[%c28, %c0_33], %22 {strides = array<i32>} : memref<36x144xbf16, #tpu.memory_space<vmem>>, vector<4x144xbf16>,
    %c0_34 = arith.constant 0 : index
    %c0_35 = arith.constant 0 : index
    %c0_36 = arith.constant 0 : index
    %c38 = arith.constant 38 : index
    %24 = vector.load %arg2[%c0_34, %c0_35, %c0_36, %c38] : memref<1x1x4x256xbf16, #tpu.memory_space<vmem>>, vector<1x1x4x144xbf16>
    %25 = vector.shape_cast %24 : vector<1x1x4x144xbf16> to vector<4x144xbf16>
    %c32 = arith.constant 32 : index
    %c0_37 = arith.constant 0 : index
    %26 = vector.load %arg6[%c32, %c0_37] : memref<36x144xbf16, #tpu.memory_space<vmem>>, vector<4x144xbf16>
    tpu.vector_store %arg6[%c32, %c0_37], %25 {strides = array<i32>} : memref<36x144xbf16, #tpu.memory_space<vmem>>, vector<4x144xbf16>,
    %c0_38 = arith.constant 0 : index
    %c0_39 = arith.constant 0 : index
    %27 = vector.load %arg3[%c0_38, %c0_39] : memref<8x36xbf16, #tpu.memory_space<vmem>>, vector<8x36xbf16>
    %c0_40 = arith.constant 0 : index
    %c0_41 = arith.constant 0 : index
    %28 = vector.load %arg6[%c0_40, %c0_41] : memref<36x144xbf16, #tpu.memory_space<vmem>>, vector<36x144xbf16>
    %cst = arith.constant dense<0.000000e+00> : vector<8x144xf32>
    %29 = tpu.matmul %27, %28, %cst {dimension_numbers = #tpu.dot_dimension_numbers<[1], [0], [0], [1], [0, 0, 1, 1], [], []>} : vector<8x36xbf16>, vector<36x144xbf16>, vector<8x144xf32> -> vector<8x144xf32>
    %c0_42 = arith.constant 0 : index
    %c0_43 = arith.constant 0 : index
    %30 = vector.load %arg4[%c0_42, %c0_43] : memref<8x1xf32, #tpu.memory_space<vmem>>, vector<8x1xf32>
    %31 = vector.broadcast %30 : vector<8x1xf32> to vector<8x144xf32>
    %32 = arith.addf %29, %31 : vector<8x144xf32>
    %cst_44 = arith.constant 0.000000e+00 : f32
    %33 = vector.broadcast %cst_44 : f32 to vector<8x144xf32>
    %34 = arith.maximumf %32, %33 : vector<8x144xf32>
    %c0_45 = arith.constant 0 : index
    %c0_46 = arith.constant 0 : index
    %35 = vector.load %arg7[%c0_45, %c0_46] : memref<8x144xf32, #tpu.memory_space<vmem>>, vector<8x144xf32>
    tpu.vector_store %arg7[%c0_45, %c0_46], %34 {strides = array<i32>} : memref<8x144xf32, #tpu.memory_space<vmem>>, vector<8x144xf32>,
    %c0_47 = arith.constant 0 : index
    %c0_48 = arith.constant 0 : index
    %36 = vector.load %arg7[%c0_47, %c0_48] : memref<8x144xf32, #tpu.memory_space<vmem>>, vector<8x16xf32>
    %c0_49 = arith.constant 0 : index
    %c0_50 = arith.constant 0 : index
    %c0_51 = arith.constant 0 : index
    %c0_52 = arith.constant 0 : index
    %37 = vector.load %arg5[%c0_49, %c0_50, %c0_51, %c0_52] : memref<1x8x8x16xf32, #tpu.memory_space<vmem>>, vector<1x8x1x16xf32>
    %38 = vector.shape_cast %37 : vector<1x8x1x16xf32> to vector<8x16xf32>
    %39 = vector.shape_cast %36 : vector<8x16xf32> to vector<1x8x1x16xf32>
    tpu.vector_store %arg5[%c0_49, %c0_50, %c0_51, %c0_52], %39 {strides = array<i32>} : memref<1x8x8x16xf32, #tpu.memory_space<vmem>>, vector<1x8x1x16xf32>,
    %c0_53 = arith.constant 0 : index
    %c18_54 = arith.constant 18 : index
    %40 = vector.load %arg7[%c0_53, %c18_54] : memref<8x144xf32, #tpu.memory_space<vmem>>, vector<8x16xf32>
    %c0_55 = arith.constant 0 : index
    %c0_56 = arith.constant 0 : index
    %c1_57 = arith.constant 1 : index
    %c0_58 = arith.constant 0 : index
    %41 = vector.load %arg5[%c0_55, %c0_56, %c1_57, %c0_58] : memref<1x8x8x16xf32, #tpu.memory_space<vmem>>, vector<1x8x1x16xf32>
    %42 = vector.shape_cast %41 : vector<1x8x1x16xf32> to vector<8x16xf32>
    %43 = vector.shape_cast %40 : vector<8x16xf32> to vector<1x8x1x16xf32>
    tpu.vector_store %arg5[%c0_55, %c0_56, %c1_57, %c0_58], %43 {strides = array<i32>} : memref<1x8x8x16xf32, #tpu.memory_space<vmem>>, vector<1x8x1x16xf32>,
    %c0_59 = arith.constant 0 : index
    %c36_60 = arith.constant 36 : index
    %44 = vector.load %arg7[%c0_59, %c36_60] : memref<8x144xf32, #tpu.memory_space<vmem>>, vector<8x16xf32>
    %c0_61 = arith.constant 0 : index
    %c0_62 = arith.constant 0 : index
    %c2_63 = arith.constant 2 : index
    %c0_64 = arith.constant 0 : index
    %45 = vector.load %arg5[%c0_61, %c0_62, %c2_63, %c0_64] : memref<1x8x8x16xf32, #tpu.memory_space<vmem>>, vector<1x8x1x16xf32>
    %46 = vector.shape_cast %45 : vector<1x8x1x16xf32> to vector<8x16xf32>
    %47 = vector.shape_cast %44 : vector<8x16xf32> to vector<1x8x1x16xf32>
    tpu.vector_store %arg5[%c0_61, %c0_62, %c2_63, %c0_64], %47 {strides = array<i32>} : memref<1x8x8x16xf32, #tpu.memory_space<vmem>>, vector<1x8x1x16xf32>,
    %c0_65 = arith.constant 0 : index
    %c54 = arith.constant 54 : index
    %48 = vector.load %arg7[%c0_65, %c54] : memref<8x144xf32, #tpu.memory_space<vmem>>, vector<8x16xf32>
    %c0_66 = arith.constant 0 : index
    %c0_67 = arith.constant 0 : index
    %c3 = arith.constant 3 : index
    %c0_68 = arith.constant 0 : index
    %49 = vector.load %arg5[%c0_66, %c0_67, %c3, %c0_68] : memref<1x8x8x16xf32, #tpu.memory_space<vmem>>, vector<1x8x1x16xf32>
    %50 = vector.shape_cast %49 : vector<1x8x1x16xf32> to vector<8x16xf32>
    %51 = vector.shape_cast %48 : vector<8x16xf32> to vector<1x8x1x16xf32>
    tpu.vector_store %arg5[%c0_66, %c0_67, %c3, %c0_68], %51 {strides = array<i32>} : memref<1x8x8x16xf32, #tpu.memory_space<vmem>>, vector<1x8x1x16xf32>,
    %c0_69 = arith.constant 0 : index
    %c72 = arith.constant 72 : index
    %52 = vector.load %arg7[%c0_69, %c72] : memref<8x144xf32, #tpu.memory_space<vmem>>, vector<8x16xf32>
    %c0_70 = arith.constant 0 : index
    %c0_71 = arith.constant 0 : index
    %c4_72 = arith.constant 4 : index
    %c0_73 = arith.constant 0 : index
    %53 = vector.load %arg5[%c0_70, %c0_71, %c4_72, %c0_73] : memref<1x8x8x16xf32, #tpu.memory_space<vmem>>, vector<1x8x1x16xf32>
    %54 = vector.shape_cast %53 : vector<1x8x1x16xf32> to vector<8x16xf32>
    %55 = vector.shape_cast %52 : vector<8x16xf32> to vector<1x8x1x16xf32>
    tpu.vector_store %arg5[%c0_70, %c0_71, %c4_72, %c0_73], %55 {strides = array<i32>} : memref<1x8x8x16xf32, #tpu.memory_space<vmem>>, vector<1x8x1x16xf32>,
    %c0_74 = arith.constant 0 : index
    %c90 = arith.constant 90 : index
    %56 = vector.load %arg7[%c0_74, %c90] : memref<8x144xf32, #tpu.memory_space<vmem>>, vector<8x16xf32>
    %c0_75 = arith.constant 0 : index
    %c0_76 = arith.constant 0 : index
    %c5 = arith.constant 5 : index
    %c0_77 = arith.constant 0 : index
    %57 = vector.load %arg5[%c0_75, %c0_76, %c5, %c0_77] : memref<1x8x8x16xf32, #tpu.memory_space<vmem>>, vector<1x8x1x16xf32>
    %58 = vector.shape_cast %57 : vector<1x8x1x16xf32> to vector<8x16xf32>
    %59 = vector.shape_cast %56 : vector<8x16xf32> to vector<1x8x1x16xf32>
    tpu.vector_store %arg5[%c0_75, %c0_76, %c5, %c0_77], %59 {strides = array<i32>} : memref<1x8x8x16xf32, #tpu.memory_space<vmem>>, vector<1x8x1x16xf32>,
    %c0_78 = arith.constant 0 : index
    %c108 = arith.constant 108 : index
    %60 = vector.load %arg7[%c0_78, %c108] : memref<8x144xf32, #tpu.memory_space<vmem>>, vector<8x16xf32>
    %c0_79 = arith.constant 0 : index
    %c0_80 = arith.constant 0 : index
    %c6 = arith.constant 6 : index
    %c0_81 = arith.constant 0 : index
    %61 = vector.load %arg5[%c0_79, %c0_80, %c6, %c0_81] : memref<1x8x8x16xf32, #tpu.memory_space<vmem>>, vector<1x8x1x16xf32>
    %62 = vector.shape_cast %61 : vector<1x8x1x16xf32> to vector<8x16xf32>
    %63 = vector.shape_cast %60 : vector<8x16xf32> to vector<1x8x1x16xf32>
    tpu.vector_store %arg5[%c0_79, %c0_80, %c6, %c0_81], %63 {strides = array<i32>} : memref<1x8x8x16xf32, #tpu.memory_space<vmem>>, vector<1x8x1x16xf32>,
    %c0_82 = arith.constant 0 : index
    %c126 = arith.constant 126 : index
    %64 = vector.load %arg7[%c0_82, %c126] : memref<8x144xf32, #tpu.memory_space<vmem>>, vector<8x16xf32>
    %c0_83 = arith.constant 0 : index
    %c0_84 = arith.constant 0 : index
    %c7 = arith.constant 7 : index
    %c0_85 = arith.constant 0 : index
    %65 = vector.load %arg5[%c0_83, %c0_84, %c7, %c0_85] : memref<1x8x8x16xf32, #tpu.memory_space<vmem>>, vector<1x8x1x16xf32>
    %66 = vector.shape_cast %65 : vector<1x8x1x16xf32> to vector<8x16xf32>
    %67 = vector.shape_cast %64 : vector<8x16xf32> to vector<1x8x1x16xf32>
    tpu.vector_store %arg5[%c0_83, %c0_84, %c7, %c0_85], %67 {strides = array<i32>} : memref<1x8x8x16xf32, #tpu.memory_space<vmem>>, vector<1x8x1x16xf32>,
    return
  }
  func.func @transform_0(%arg0: i32, %arg1: i32) -> (i32, i32, i32, i32) {
    %c0_i32 = arith.constant 0 : i32
    %c0_i32_0 = arith.constant 0 : i32
    %c0_i32_1 = arith.constant 0 : i32
    return %arg0, %arg1, %c0_i32, %c0_i32_0 : i32, i32, i32, i32
  }
  func.func @transform_1(%arg0: i32, %arg1: i32) -> (i32, i32) {
    %c0_i32 = arith.constant 0 : i32
    %c0_i32_0 = arith.constant 0 : i32
    %c0_i32_1 = arith.constant 0 : i32
    return %c0_i32, %c0_i32_0 : i32, i32
  }
  func.func @transform_2(%arg0: i32, %arg1: i32) -> (i32, i32) {
    %c0_i32 = arith.constant 0 : i32
    %c0_i32_0 = arith.constant 0 : i32
    %c0_i32_1 = arith.constant 0 : i32
    return %c0_i32, %c0_i32_0 : i32, i32
  }
  func.func @transform_3(%arg0: i32, %arg1: i32) -> (i32, i32, i32, i32) {
    %c0_i32 = arith.constant 0 : i32
    %c0_i32_0 = arith.constant 0 : i32
    %c0_i32_1 = arith.constant 0 : i32
    return %arg0, %c0_i32, %arg1, %c0_i32_0 : i32, i32, i32, i32
  }
}

</mosaic_0001>

<bundles_post_ra>
// kernel: tpu_custom_call.1
= control target key start
LH: loop header
LB: loop body
LE: loop exit
PB: predicated region body
PF: predicated region fallthrough
CT: control target
= control target key end

     0   :  { %8 = vsyncpa [#allocation5], 0  ;;  %s2353_s0 = inlined_call_operand.hbm [shape: bf16[2,2,4,256], index: 0, kind: input, shape index: {}]   ;;  %s2354_s1 = inlined_call_operand.vmem [shape: bf16[8,36], index: 1, kind: input, shape index: {}]   ;;  %s2355_s2 = inlined_call_operand.vmem [shape: f32[8,1], index: 2, kind: input, shape index: {}]   ;;  %s2356_s3 = inlined_call_operand.hbm [shape: f32[2,8,16,16], index: 3, kind: output, shape index: {}]  }
   0x1   :  { %10 = vsyncpa [#allocation5 + $0x1], 0 }
   0x2   :  { %11 = vsyncpa [#allocation6], 0 }
   0x3   :  { %13 = vsyncpa [#allocation6 + $0x1], 0  ;;  %s1795_s12 = smov 0   ;;  %s1797_s13 = smov 0  }
   0x4   :  { %s1799_s14 = smov 0   ;;  %s1801_s15 = smov 0  }
   0x5   :  { %s1803_s16 = smov 0   ;;  %s1805_s17 = smov 0  }
   0x6   :  { %s1807_s18 = smov 0   ;;  %s1809_s19 = smov 0  }
   0x7 LB: > { %s1485_s20 = sadd.s32 4294967295, %s1752_s19   ;;  %s1486_s21 = sadd.s32 4294967294, %s1752_s19   ;;  %s1752_s19 = sphi %s1809_s19, %s19_s19   ;;  %s1748_s18 = sphi %s1807_s18, %s2377_s18   ;;  %s1744_s17 = sphi %s1805_s17, %s2376_s17   ;;  %s1740_s16 = sphi %s1803_s16, %s2375_s16   ;;  %s1736_s15 = sphi %s1801_s15, %s2374_s15   ;;  %s1732_s14 = sphi %s1799_s14, %s2373_s14   ;;  %s1728_s13 = sphi %s1797_s13, %s2372_s13   ;;  %s1724_s12 = sphi %s1795_s12, %s2371_s12  }
   0x8   : > { %s28_s22 = sadd.s32 1, %s1744_s17  ;;  %s31_s23 = sadd.s32 1, %s1748_s18 }
   0x9   : > { %p29_p0 = scmp.ge.s32.totalorder %s28_s22, 2  ;;  %s40_s24 = sadd.s32 1, %s1732_s14 }
   0xa   : > { %p47_p1 = scmp.ne.s32.totalorder %s1732_s14, %s1728_s13  ;;  %p48_p2 = scmp.eq.s32.totalorder %s1752_s19, 0 }
   0xb   : > { %s2379_s22 = smov (%p29_p0, %s28_s22), 0  ;;  %s2381_s23 = smov (!%p29_p0, %s31_s23), %s1748_s18 }
   0xc   : > { %s36_s25 = ssub.s32 %s1744_s17, %s2379_s22  ;;  %p1848_p3 = por %p48_p2, %p47_p1 }
   0xd   : > { %p33_p4 = scmp.ge.s32.totalorder %s2381_s23, 2  ;;  %p53_p5 = scmp.ne.s32.totalorder %s1728_s13, %s1724_s12 }
   0xe   : > { %p54_p6 = scmp.eq.s32.totalorder %s1485_s20, 0  ;;  %p121_p7 = scmp.eq.s32.totalorder %s1485_s20, 3 }
   0xf   : > { %s2383_s23 = smov (%p33_p4, %s2381_s23), 0  ;;  %p127_p10 = scmp.eq.s32.totalorder %s1486_s21, 3 }
  0x10   : > { %p1856_p8 = por %p54_p6, %p53_p5  ;;  %p1860_p9 = por %p121_p7, %p47_p1 }
  0x11   : > { %s35_s29 = ssub.s32 %s1748_s18, %s2383_s23  ;;  %p1866_p12 = por %p127_p10, %p53_p5 }
  0x12   : > { %s2360_s28 = scalar_select %p1860_p9, 1, 0 }
  0x13   : > { %s37_s30 = sor.u32 %s36_s25, %s35_s29  ;;  %p1526_p13 = scmp.lt.s32.totalorder %s1752_s19, 4 }
  0x14   : > { %p38_p11 = scmp.eq.s32.totalorder %s37_s30, 0  ;;  %s153_s5 = sand.u32 1, %s1732_s14  }
  0x15   : > { %s2361_s4 = scalar_select %p1866_p12, 1, 0 }
  0x16   : > { %s1873_s6 = scalar_select %p38_p11, %s1732_s14, %s40_s24  }
  0x17   : > { %s1489_s7 = sshll.u32 %s153_s5, 2  ;;  %s1490_s8 = sshll.u32 %s1744_s17, 1 }
  0x18   : > { %s1491_s9 = sshll.u32 %s1748_s18, 2  ;;  %s157_s10 = scalar_lea.vmem [#allocation4], %s1489_s7 }
  0x19   : > { %s167_s11 = sshll.u32 %s157_s10, 4  ;;  %s163_s20 = sadd.s32 %s1491_s9, %s1490_s8  ;;  %s1877_s11 = int_to_ptr.vmem [resolvable:$true] %s167_s11 }
  0x1a   : > { %s1492_s21 = sshll.u32 %s163_s20, 5  ;;  %p1881_p0 = pnand %p1526_p13, %p1848_p3 }
  0x1b   : > { %s1888_s24 = scalar_lea.hbm %s2353_s0, %s1492_s21  ;;  %s154_s7 = scalar_lea.sflag [#allocation5], %s153_s5 }
  0x1c   : > { %s1624_s8 = scalar_lea.hbm %s1888_s24, 64  ;;  %p1626_p3 = pneg %p1881_p0 }
  0x1d   : > { %p1625_p4 = scmp.ne.s32.totalorder %s1888_s24, %s1624_s8  ;;  %s1629_s10 = scalar_lea.hbm %s2353_s0, 256 }
  0x1e   : > { %p1630_p7 = scmp.lt.u32.totalorder %s1888_s24, %s2353_s0  ;;  %p1631_p10 = scmp.lt.u32.totalorder %s1629_s10, %s1624_s8 }
  0x1f   : > { %p1627_p5 = pnand %p1626_p3, %p1625_p4  ;;  %p1633_p13 = scmp.lt.u32.totalorder %s1624_s8, %s1888_s24 }
  0x20   : > { %p1632_p11 = por %p1631_p10, %p1630_p7 }
  0x21   : > { %p1628_p6 = pneg %p1627_p5 }
  0x22   : > { %p1634_p1 = por %p1633_p13, %p1632_p11 }
  0x24   : > { %p1635_p2 = pnand %p1634_p1, %p1628_p6 }
  0x26   : > { %1638 = shalt.err (!%p1635_p2)
}
  0x27   : > { %s1639_s5 = scalar_lea.vmem %s1877_s11, 64  ;;  %s1754_s29 = smov [#allocation4]  }
  0x28   : > { %p1640_p4 = scmp.ne.s32.totalorder %s1877_s11, %s1639_s5  ;;  %s1644_s30 = sshll.u32 %s1754_s29, 4  ;;  %s1645_s30 = int_to_ptr.vmem [resolvable:$false] %s1644_s30 }
  0x29   : > { %s1646_s26 = scalar_lea.vmem %s1645_s30, 128  ;;  %p1647_p9 = scmp.lt.s32.totalorder %s1877_s11, %s1645_s30 }
  0x2a   : > { %p1642_p5 = pnand %p1640_p4, %p1626_p3  ;;  %p1648_p7 = scmp.lt.s32.totalorder %s1646_s26, %s1639_s5 }
  0x2c   : > { %p1643_p12 = pneg %p1642_p5  ;;  %p1649_p10 = por %p1648_p7, %p1647_p9 }
  0x2e   : > { %p1650_p11 = pnand %p1649_p10, %p1643_p12 }
  0x30   : > { %1653 = shalt.err (!%p1650_p11)
}
  0x31   : > { %1521 = dma.hbm_to_vmem [thread:$0]  (!%p1881_p0), %s1888_s24, 64, %s1877_s11, %s154_s7  }
  0x32   : > { %p2363_p1 = scmp.lt.s32.totalorder %s1752_s19, 5  ;;  %p2364_p2 = scmp.ge.s32.totalorder %s1752_s19, 1 }
  0x34   : > { %p173_p3 = pnand %p2364_p2, %p2363_p1 }
  0x35   : > { %s1922_s8 = sand.u32 (!%p173_p3), 1, %s1728_s13  }
  0x36   : > { %176 = sbr.rel (%p173_p3) target bundleno = 696 (0x2b8), region = 32  ;;  %s1494_s9 = sshll.u32 (!%p173_p3), %s1922_s8, 2 }
  0x37   : > { %s179_s10 = scalar_lea.sflag (!%p173_p3), [#allocation5], %s1922_s8  ;;  %s182_s20 = scalar_lea.vmem (!%p173_p3), [#allocation4], %s1494_s9 }
  0x3d   : > { %1715 = dma.done.wait (%p1856_p8), %s179_s10, 64  }
  0x3e   : > { %1717 = vsyncadd (%p1856_p8), %s179_s10, 4294967232  ;;  %v226_v0 = vlaneseq  ;;  %v1755_v1 = vmov 1983009808   ;;  %vm216_vm0 = vcmask 1041408   ;;  %vm217_vm1 = vcmask 128004   ;;  %s1756_s11 = smov 109  }
  0x3f   : > { %v224_v2 = vunpack.c.l.s4 %v1755_v1  ;;  %v1498_v6 = vld.sshfl [vmem:[%s182_s20] sm:$0x33 pattern:$0x76325410]  ;;  %vm1934_vm2 = vmor %vm217_vm1, %vm216_vm0  ;;  %s1757_s27 = smov 126   ;;  %s1758_s25 = smov 110  }
  0x40   : > { %v1930_v3 = vshrl.u32 %v226_v0, 7  ;;  %282 = vrot.lane.b32.xlu1 %v1498_v6, %s1756_s11  ;;  %249 = vrot.lane.b32.xlu0 %v1498_v6, %s1757_s27  ;;  %v1612_v8 = vld [vmem:[%s182_s20] ss:$0 sps:$4 sm:$0xff]   ;;  %219 = vst.msk [vmem:[#allocation2] sm:$0x33] %vm1934_vm2, %v1498_v6  ;;  %s1759_s24 = smov 127  }
  0x41   : > { %v225_v4 = vunpack.c.0.s8 %v224_v2  ;;  %v1613_v9 = vld [vmem:[%s182_s20] ss:$0 sps:$4 sm:$0xff]   ;;  %s1760_s7 = smov 92   ;;  %s1761_s21 = smov 108   ;;  %v1764_v16 = vmov 0   ;;  %v361_v17 = vld [vmem:[%s2355_s2] sm:$0xff] }
  0x42   : > { %v1614_v10 = vld [vmem:[%s182_s20] ss:$0 sps:$4 sm:$0xff]   ;;  %s1762_s5 = smov 90   ;;  %s1763_s29 = smov 91   ;;  %434 = vmatprep.mubr.bf16.mxu0 %v1764_v16  ;;  %1611 = vset.pattern.permute.xlu0 %v1764_v16  ;;  %vm285_vm3 = vcmask 891904   ;;  %vm252_vm4 = vcmask 1031168  }
  0x43   : > { %v228_v5 = vsub.s32 %v225_v4, %v1930_v3  ;;  %v1615_v14 = vld [vmem:[%s182_s20] ss:$0 sps:$4 sm:$0xff]   ;;  %vm236_vm5 = vcmask 1043458   ;;  %vm237_vm6 = vcmask 130054   ;;  %vm269_vm7 = vcmask 900096   ;;  %s1495_s20 = sshll.u32 %s1922_s8, 6 }
  0x44   : > { %vm1949_vm8 = vmor %vm237_vm6, %vm236_vm5  ;;  %vm233_vm9 = vcmask 1039360   ;;  %vm318_vm10 = vcmask 752640   ;;  %vm302_vm11 = vcmask 883712   ;;  %vm351_vm12 = vcmask 736256   ;;  %v355_v51 = vld [vmem:[%s2354_s1] sm:$0xf] }
  0x45   : > { %v265_v11 = vrot.slane %v1612_v8, %v228_v5  ;;  %v229_v12 = vrot.slane %v1613_v9, %v228_v5  ;;  %v298_v13 = vrot.slane %v1614_v10, %v228_v5  ;;  %v331_v15 = vrot.slane %v1615_v14, %v228_v5  ;;  %s1982_s11 = scalar_lea.vmem [#allocation7], %s1495_s20  ;;  %s1766_s27 = smov 74  }
  0x46   : > { %vm335_vm13 = vcmask 744448   ;;  %vm392_vm14 = vcmask 293888   ;;  %v1765_v52 = vmov 1966171168   ;;  %vm446_vm15 = vcmask 130048   ;;  %s1396_s30 = sshll.u32 %s1982_s11, 4  ;;  %s2290_s30 = int_to_ptr.vmem [resolvable:$true] %s1396_s30 }
  0x47   : > { %266 = vrot.lane.b32.xlu1 %v265_v11, %s1758_s25  ;;  %230 = vrot.lane.b32.xlu0 %v229_v12, %s1759_s24  ;;  %v452_v53 = vunpack.c.l.s4 %v1765_v52  ;;  %v1976_v4 = vsub.s32 0, %v1930_v3  ;;  %s1767_s24 = smov 56   ;;  %vm1356_vm1 = vcmask 15360   ;;  %s1382_s10 = scalar_lea.sflag [#allocation6], %s1922_s8 }
  0x48   : > { %s1654_s20 = scalar_lea.vmem %s2290_s30, 1024  ;;  %p2369_p9 = scmp.ne.s32.totalorder %s2360_s28, 0 }
  0x49   : > { %v453_v54 = vunpack.c.0.s8 %v452_v53  ;;  %p1655_p8 = scmp.ne.s32.totalorder %s2290_s30, %s1654_s20 }
  0x4b   : > { %315 = vrot.lane.b32.xlu1 %v1498_v6, %s1760_s7  ;;  %299 = vrot.lane.b32.xlu0 %v298_v13, %s1761_s21  ;;  %v1971_v57 = vsub.s32 %v453_v54, %v1930_v3  ;;  %s1768_s21 = smov 38   ;;  %p1656_p12 = pnand %p1655_p8, %p2369_p9 }
  0x4d   : > { %p1657_p0 = pneg %p1656_p12 }
  0x4f   : > { %348 = vrot.lane.b32.xlu1 %v1498_v6, %s1762_s5  ;;  %332 = vrot.lane.b32.xlu0 %v331_v15, %s1763_s29  ;;  %s1769_s5 = smov 20   ;;  %s1770_s29 = smov 2  }
  0x53   : > { %364 = vperm.xlu0 %1611, %v361_v17  }
  0xb2   : > { %v283_v18 = vpop.permute.xlu1 %282  ;;  %v250_v19 = vpop.permute.xlu0 %249 }
  0xb3   : > { %v284_v20 = vrot.slane %v283_v18, 4  ;;  %v251_v21 = vrot.slane %v250_v19, 4 }
  0xb5   : > { %v286_v22 = vsel %vm285_vm3, %v283_v18, %v284_v20  ;;  %v253_v23 = vsel %vm252_vm4, %v250_v19, %v251_v21 }
  0xb6   : > { %288 = vst.msk [vmem:[#allocation2 + $0x10] sm:$0x33] %vm1934_vm2, %v286_v22  ;;  %255 = vst.msk [vmem:[#allocation2 + $0x8] sm:$0x33] %vm1934_vm2, %v253_v23 }
  0xb9   : > { %v267_v24 = vpop.permute.xlu1 %266  ;;  %v231_v27 = vpop.permute.xlu0 %230 }
  0xba   : > { %v268_v26 = vrot.slane %v267_v24, 4  ;;  %v232_v28 = vrot.slane %v231_v27, 4 }
  0xbc   : > { %v270_v29 = vsel %vm269_vm7, %v267_v24, %v268_v26  ;;  %v234_v30 = vsel %vm233_vm9, %v231_v27, %v232_v28  ;;  %v2015_v24 = vsub.s32 1, %v1930_v3 }
  0xbd   : > { %272 = vst.msk [vmem:[#allocation2 + $0x8] sm:$0xcc] %vm1949_vm8, %v270_v29  ;;  %v316_v31 = vpop.permute.xlu1 %315  ;;  %239 = vst.msk [vmem:[#allocation2] sm:$0xcc] %vm1949_vm8, %v234_v30  ;;  %v300_v32 = vpop.permute.xlu0 %299 }
  0xbe   : > { %v317_v33 = vrot.slane %v316_v31, 4  ;;  %v301_v34 = vrot.slane %v300_v32, 4 }
  0xc0   : > { %v319_v35 = vsel %vm318_vm10, %v316_v31, %v317_v33  ;;  %v303_v36 = vsel %vm302_vm11, %v300_v32, %v301_v34 }
  0xc1   : > { %321 = vst.msk [vmem:[#allocation2 + $0x18] sm:$0x33] %vm1934_vm2, %v319_v35  ;;  %v349_v37 = vpop.permute.xlu1 %348  ;;  %v333_v38 = vpop.permute.xlu0 %332 }
  0xc2   : > { %305 = vst.msk [vmem:[#allocation2 + $0x10] sm:$0xcc] %vm1949_vm8, %v303_v36  ;;  %v350_v39 = vrot.slane %v349_v37, 4  ;;  %v334_v40 = vrot.slane %v333_v38, 4 }
  0xc4   : > { %v352_v41 = vsel %vm351_vm12, %v349_v37, %v350_v39  ;;  %v336_v42 = vsel %vm335_vm13, %v333_v38, %v334_v40  ;;  %v1616_v43 = vld [vmem:[#allocation2 + $0x4] ss:$8 sps:$4 sm:$0xff]   ;;  %v1618_v44 = vld [vmem:[#allocation2] ss:$8 sps:$4 sm:$0xff]  }
  0xc5   : > { %354 = vst.msk [vmem:[#allocation2 + $0x20] sm:$0x33] %vm1934_vm2, %v352_v41  ;;  %402 = vmatprep.subr.bf16.mxu0 %v1616_v43 }
  0xc6   : > { %338 = vst.msk [vmem:[#allocation2 + $0x18] sm:$0xcc] %vm1949_vm8, %v336_v42  ;;  %403 = vmatpush1.bf16.msra.mxu0 %v1618_v44 }
  0xcc   : > { %v360_v45 = vld [vmem:[#allocation2 + $0x20] sm:$0x33] }
  0xcd   : > { %v1619_v46 = vld [vmem:[#allocation2 + $0x14] ss:$8 sps:$4 sm:$0xff]   ;;  %v1621_v47 = vld [vmem:[#allocation2 + $0x10] ss:$8 sps:$4 sm:$0xff]   ;;  %v1506_v48 = vcombine.high %v360_v45, %v360_v45  ;;  %v1505_v49 = vcombine.low %v360_v45, %v360_v45 }
  0xce   : > { %404 = vmatprep.subr.bf16.mxu0 %v1619_v46 }
  0xcf   : > { %405 = vmatpush1.bf16.msra.mxu0 %v1621_v47  ;;  %v397_v50 = vsel %vm216_vm0, %v1505_v49, 0 }
  0xd0   : > { %1507 = vmatprep.subr.msk.bf16.mxu0 %vm216_vm0, %v1506_v48  ;;  %vm507_vm0 = vcmask 122880  }
  0xd2   : > { %v365_v55 = vpop.permute.xlu0 %364 }
  0xd3   : > { %407 = vmatpush1.bf16.msra.mxu0 %v397_v50 }
  0xd6   : > { %1508 = vmatmul.mubr.msk.bf16.vlgmr.msra.gmra.mrb[0].mxu0 %vm392_vm14, %v355_v51 }
 0x1a9   : > { %v436_v56 = vpop.f32.mrb[0].mxu0 }
 0x1aa   : > { %v437_v58 = vadd.f32 %v436_v56, %v365_v55  ;;  %v438_v59 = vpop.f32.mrb[1].mxu0 }
 0x1ab   : > { %v439_v60 = vadd.f32 %v438_v59, %v365_v55  ;;  %v440_v61 = vpop.f32.mrb[2].mxu0 }
 0x1ac   : > { %v443_v62 = vmax.f32 %v437_v58, 0.0  ;;  %v441_v63 = vpop.f32.mrb[3].mxu0 }
 0x1ad   : > { %v444_v0 = vmax.f32 %v439_v60, 0.0 }
 0x1ae   : > { %v450_v1 = vcombine.high %v443_v62, %v443_v62  ;;  %v457_v2 = vrot.slane %v443_v62, %v1971_v57 }
 0x1af   : > { %447 = vst.msk [vmem:[#allocation3 + $0x8] sm:$0xff] %vm446_vm15, %v444_v0 }
 0x1b0   : > { %v464_v5 = vrot.slane %v450_v1, %v1971_v57  ;;  %v465_v6 = vcombine.high %v457_v2, %v457_v2  ;;  %v473_v7 = vrot.slane %v457_v2, %v1971_v57 }
 0x1b2   : > { %v466_v8 = vcombine.high %v464_v5, %v464_v5  ;;  %v480_v9 = vrot.slane %v464_v5, %v1971_v57  ;;  %v487_v10 = vrot.slane %v465_v6, %v1971_v57  ;;  %v495_v11 = vcombine.high %v473_v7, %v473_v7  ;;  %508 = vst.msk [vmem:[%s1982_s11] sm:$0x1] %vm507_vm0, %v473_v7 }
 0x1b3   : > { %v685_v12 = vrot.slane %v473_v7, %v1976_v4 }
 0x1b4   : > { %v494_v13 = vrot.slane %v466_v8, %v1971_v57  ;;  %v496_v14 = vcombine.high %v480_v9, %v480_v9  ;;  %v497_v15 = vcombine.high %v487_v10, %v487_v10  ;;  %509 = vst.msk [vmem:[%s1982_s11 + $0x8] sm:$0x1] %vm507_vm0, %v487_v10  ;;  %510 = vst.msk [vmem:[%s1982_s11 + $0x10] sm:$0x1] %vm507_vm0, %v495_v11 }
 0x1b5   : > { %512 = vst.msk [vmem:[%s1982_s11 + $0x20] sm:$0x1] %vm507_vm0, %v480_v9  ;;  %v574_v16 = vrot.slane %v487_v10, %v1976_v4  ;;  %714 = vrot.lane.b32.xlu0 %v685_v12, %s1760_s7  ;;  %599 = vrot.lane.b32.xlu1 %v685_v12, %s1758_s25  ;;  %v2004_v18 = vrot.slane %v495_v11, %v1976_v4 }
 0x1b6   : > { %v498_v17 = vcombine.high %v494_v13, %v494_v13  ;;  %511 = vst.msk [vmem:[%s1982_s11 + $0x18] sm:$0x1] %vm507_vm0, %v497_v15  ;;  %513 = vst.msk [vmem:[%s1982_s11 + $0x28] sm:$0x1] %vm507_vm0, %v494_v13  ;;  %v1207_v19 = vld [vmem:[#allocation3 + $0x8] sm:$0xff]  ;;  %v2007_v20 = vrot.slane %v480_v9, %v1976_v4  ;;  %v2012_v23 = vrot.slane %v497_v15, %v1976_v4 }
 0x1b7   : > { %514 = vst.msk [vmem:[%s1982_s11 + $0x30] sm:$0x1] %vm507_vm0, %v496_v14  ;;  %v1210_v21 = vcombine.low %v443_v62, %v1207_v19  ;;  %v1211_v22 = vcombine.high %v443_v62, %v1207_v19  ;;  %v2022_v27 = vrot.slane %v494_v13, %v1976_v4  ;;  %v2037_v33 = vrot.slane %v496_v14, %v1976_v4 }
 0x1b8   : > { %515 = vst.msk [vmem:[%s1982_s11 + $0x38] sm:$0x1] %vm507_vm0, %v498_v17  ;;  %v2048_v38 = vrot.slane %v498_v17, %v1976_v4 }
 0x1b9   : > { %829 = vrot.lane.b32.xlu0 %v685_v12, %s1766_s27  ;;  %601 = vrot.lane.b32.xlu1 %v574_v16, %s1758_s25  ;;  %v1218_v25 = vrot.slane %v1210_v21, %v1971_v57  ;;  %v1225_v26 = vrot.slane %v1211_v22, %v1971_v57 }
 0x1bb   : > { %v1234_v28 = vrot.slane %v1218_v25, %v1971_v57  ;;  %v2026_v29 = vrot.slane %v1225_v26, %v1971_v57  ;;  %v1226_v34 = vcombine.high %v1218_v25, %v1218_v25  ;;  %v1227_v36 = vcombine.high %v1225_v26, %v1225_v26 }
 0x1bd   : > { %944 = vrot.lane.b32.xlu0 %v685_v12, %s1767_s24  ;;  %716 = vrot.lane.b32.xlu1 %v574_v16, %s1760_s7  ;;  %v1267_v3 = vrot.slane %v1234_v28, %v2015_v24  ;;  %v1299_v30 = vrot.slane %v2026_v29, %v2015_v24  ;;  %v1263_v31 = vrot.slane %v1234_v28, %v1976_v4 }
 0x1be   : > { %v1295_v32 = vrot.slane %v2026_v29, %v1976_v4  ;;  %v2041_v35 = vcombine.high %v1234_v28, %v1234_v28  ;;  %v2045_v37 = vcombine.high %v2026_v29, %v2026_v29  ;;  %v1248_v39 = vrot.slane %v1226_v34, %v1971_v57 }
 0x1bf   : > { %v1255_v42 = vrot.slane %v1227_v36, %v1971_v57 }
 0x1c0   : > { %v1283_v40 = vrot.slane %v2041_v35, %v2015_v24  ;;  %v1279_v41 = vrot.slane %v2041_v35, %v1976_v4  ;;  %v1315_v43 = vrot.slane %v2045_v37, %v2015_v24  ;;  %v1311_v44 = vrot.slane %v2045_v37, %v1976_v4 }
 0x1c1   : > { %1059 = vrot.lane.b32.xlu0 %v685_v12, %s1768_s21  ;;  %831 = vrot.lane.b32.xlu1 %v574_v16, %s1766_s27  ;;  %v1275_v45 = vrot.slane %v1248_v39, %v2015_v24  ;;  %v1271_v46 = vrot.slane %v1248_v39, %v1976_v4  ;;  %v2064_v47 = vcombine.high %v1248_v39, %v1248_v39 }
 0x1c2   : > { %v1307_v48 = vrot.slane %v1255_v42, %v2015_v24  ;;  %v1303_v49 = vrot.slane %v1255_v42, %v1976_v4  ;;  %v2068_v50 = vcombine.high %v1255_v42, %v1255_v42 }
 0x1c3   : > { %v1287_v51 = vrot.slane %v2064_v47, %v1976_v4  ;;  %v1291_v52 = vrot.slane %v2064_v47, %v2015_v24 }
 0x1c4   : > { %v1319_v53 = vrot.slane %v2068_v50, %v1976_v4  ;;  %v1323_v54 = vrot.slane %v2068_v50, %v2015_v24 }
 0x1c5   : > { %1174 = vrot.lane.b32.xlu0 %v685_v12, %s1769_s5  ;;  %946 = vrot.lane.b32.xlu1 %v574_v16, %s1767_s24 }
 0x1c9   : > { %603 = vrot.lane.b32.xlu0 %v2004_v18, %s1758_s25  ;;  %1061 = vrot.lane.b32.xlu1 %v574_v16, %s1768_s21 }
 0x1cd   : > { %1176 = vrot.lane.b32.xlu1 %v574_v16, %s1769_s5  ;;  %607 = vrot.lane.b32.xlu0 %v2007_v20, %s1758_s25 }
 0x1d1   : > { %1326 = vrot.lane.b32.xlu1 %v1267_v3, %s1770_s29  ;;  %718 = vrot.lane.b32.xlu0 %v2004_v18, %s1760_s7 }
 0x1d5   : > { %1342 = vrot.lane.b32.xlu1 %v1299_v30, %s1770_s29  ;;  %722 = vrot.lane.b32.xlu0 %v2007_v20, %s1760_s7 }
 0x1d9   : > { %605 = vrot.lane.b32.xlu1 %v2012_v23, %s1758_s25  ;;  %833 = vrot.lane.b32.xlu0 %v2004_v18, %s1766_s27 }
 0x1dd   : > { %837 = vrot.lane.b32.xlu0 %v2007_v20, %s1766_s27  ;;  %609 = vrot.lane.b32.xlu1 %v2022_v27, %s1758_s25 }
 0x1e1   : > { %948 = vrot.lane.b32.xlu0 %v2004_v18, %s1767_s24  ;;  %720 = vrot.lane.b32.xlu1 %v2012_v23, %s1760_s7 }
 0x1e5   : > { %952 = vrot.lane.b32.xlu0 %v2007_v20, %s1767_s24  ;;  %724 = vrot.lane.b32.xlu1 %v2022_v27, %s1760_s7 }
 0x1e9   : > { %1063 = vrot.lane.b32.xlu0 %v2004_v18, %s1768_s21  ;;  %835 = vrot.lane.b32.xlu1 %v2012_v23, %s1766_s27 }
 0x1ed   : > { %1067 = vrot.lane.b32.xlu0 %v2007_v20, %s1768_s21  ;;  %839 = vrot.lane.b32.xlu1 %v2022_v27, %s1766_s27 }
 0x1f1   : > { %1178 = vrot.lane.b32.xlu0 %v2004_v18, %s1769_s5  ;;  %950 = vrot.lane.b32.xlu1 %v2012_v23, %s1767_s24 }
 0x1f5   : > { %1182 = vrot.lane.b32.xlu0 %v2007_v20, %s1769_s5  ;;  %954 = vrot.lane.b32.xlu1 %v2022_v27, %s1767_s24 }
 0x1f9   : > { %1324 = vrot.lane.b32.xlu0 %v1263_v31, %s1770_s29  ;;  %1065 = vrot.lane.b32.xlu1 %v2012_v23, %s1768_s21 }
 0x1fd   : > { %1340 = vrot.lane.b32.xlu0 %v1295_v32, %s1770_s29  ;;  %1069 = vrot.lane.b32.xlu1 %v2022_v27, %s1768_s21 }
 0x201   : > { %611 = vrot.lane.b32.xlu0 %v2037_v33, %s1758_s25  ;;  %1180 = vrot.lane.b32.xlu1 %v2012_v23, %s1769_s5 }
 0x205   : > { %726 = vrot.lane.b32.xlu0 %v2037_v33, %s1760_s7  ;;  %1184 = vrot.lane.b32.xlu1 %v2022_v27, %s1769_s5 }
 0x209   : > { %841 = vrot.lane.b32.xlu0 %v2037_v33, %s1766_s27  ;;  %1330 = vrot.lane.b32.xlu1 %v1275_v45, %s1770_s29 }
 0x20d   : > { %956 = vrot.lane.b32.xlu0 %v2037_v33, %s1767_s24  ;;  %1334 = vrot.lane.b32.xlu1 %v1283_v40, %s1770_s29 }
 0x211   : > { %1071 = vrot.lane.b32.xlu0 %v2037_v33, %s1768_s21  ;;  %1346 = vrot.lane.b32.xlu1 %v1307_v48, %s1770_s29 }
 0x215   : > { %1328 = vrot.lane.b32.xlu0 %v1271_v46, %s1770_s29  ;;  %1350 = vrot.lane.b32.xlu1 %v1315_v43, %s1770_s29 }
 0x219   : > { %1332 = vrot.lane.b32.xlu0 %v1279_v41, %s1770_s29  ;;  %613 = vrot.lane.b32.xlu1 %v2048_v38, %s1758_s25  ;;  %s1510_s25 = sshll.u32 %s1740_s16, 4 }
 0x21d   : > { %1344 = vrot.lane.b32.xlu0 %v1303_v49, %s1770_s29  ;;  %728 = vrot.lane.b32.xlu1 %v2048_v38, %s1760_s7  ;;  %s1393_s7 = sadd.s32 %s1736_s15, %s1510_s25 }
 0x21e   : > { %s1511_s26 = sshll.u32 %s1393_s7, 7 }
 0x21f   : > { %s2297_s9 = scalar_lea.hbm %s2356_s3, %s1511_s26 }
 0x221   : > { %1348 = vrot.lane.b32.xlu0 %v1311_v44, %s1770_s29  ;;  %843 = vrot.lane.b32.xlu1 %v2048_v38, %s1766_s27  ;;  %s1771_s27 = smov [#allocation7]  }
 0x225   : > { %1336 = vrot.lane.b32.xlu0 %v1287_v51, %s1770_s29  ;;  %958 = vrot.lane.b32.xlu1 %v2048_v38, %s1767_s24  ;;  %s1658_s24 = sshll.u32 %s1771_s27, 4  ;;  %s1659_s24 = int_to_ptr.vmem [resolvable:$false] %s1658_s24 }
 0x226   : > { %p1661_p6 = scmp.lt.s32.totalorder %s2290_s30, %s1659_s24 }
 0x227   : > { %v715_v55 = vpop.permute.xlu0 %714  ;;  %v600_v56 = vpop.permute.xlu1 %599 }
 0x228   : > { %738 = vst.msk [vmem:[%s1982_s11 + $0x2] sm:$0x1] %vm507_vm0, %v715_v55  ;;  %623 = vst.msk [vmem:[%s1982_s11 + $0x1] sm:$0x1] %vm507_vm0, %v600_v56 }
 0x229   : > { %1352 = vrot.lane.b32.xlu0 %v1319_v53, %s1770_s29  ;;  %1073 = vrot.lane.b32.xlu1 %v2048_v38, %s1768_s21  ;;  %s1660_s21 = scalar_lea.vmem %s1659_s24, 2048 }
 0x22a   : > { %p1662_p13 = scmp.lt.s32.totalorder %s1660_s21, %s1654_s20 }
 0x22b   : > { %v830_v57 = vpop.permute.xlu0 %829  ;;  %v602_v58 = vpop.permute.xlu1 %601 }
 0x22c   : > { %853 = vst.msk [vmem:[%s1982_s11 + $0x3] sm:$0x1] %vm507_vm0, %v830_v57  ;;  %624 = vst.msk [vmem:[%s1982_s11 + $0x9] sm:$0x1] %vm507_vm0, %v602_v58  ;;  %p1663_p4 = por %p1662_p13, %p1661_p6 }
 0x22d   : > { %1186 = vrot.lane.b32.xlu0 %v2037_v33, %s1769_s5  ;;  %1338 = vrot.lane.b32.xlu1 %v1291_v52, %s1770_s29 }
 0x22e   : > { %p1664_p5 = pnand %p1663_p4, %p1657_p0 }
 0x22f   : > { %v945_v59 = vpop.permute.xlu0 %944  ;;  %v717_v60 = vpop.permute.xlu1 %716 }
 0x230   : > { %968 = vst.msk [vmem:[%s1982_s11 + $0x4] sm:$0x1] %vm507_vm0, %v945_v59  ;;  %739 = vst.msk [vmem:[%s1982_s11 + $0xa] sm:$0x1] %vm507_vm0, %v717_v60 }
 0x231   : > { %1354 = vrot.lane.b32.xlu1 %v1323_v54, %s1770_s29 }
 0x233   : > { %v1060_v61 = vpop.permute.xlu0 %1059  ;;  %v832_v62 = vpop.permute.xlu1 %831 }
 0x234   : > { %1083 = vst.msk [vmem:[%s1982_s11 + $0x5] sm:$0x1] %vm507_vm0, %v1060_v61  ;;  %854 = vst.msk [vmem:[%s1982_s11 + $0xb] sm:$0x1] %vm507_vm0, %v832_v62 }
 0x235   : > { %1188 = vrot.lane.b32.xlu1 %v2048_v38, %s1769_s5 }
 0x237   : > { %v1175_v63 = vpop.permute.xlu0 %1174  ;;  %v947_v0 = vpop.permute.xlu1 %946 }
 0x238   : > { %1198 = vst.msk [vmem:[%s1982_s11 + $0x6] sm:$0x1] %vm507_vm0, %v1175_v63  ;;  %969 = vst.msk [vmem:[%s1982_s11 + $0xc] sm:$0x1] %vm507_vm0, %v947_v0 }
 0x23b   : > { %v604_v1 = vpop.permute.xlu0 %603  ;;  %v1062_v2 = vpop.permute.xlu1 %1061 }
 0x23c   : > { %625 = vst.msk [vmem:[%s1982_s11 + $0x11] sm:$0x1] %vm507_vm0, %v604_v1  ;;  %1084 = vst.msk [vmem:[%s1982_s11 + $0xd] sm:$0x1] %vm507_vm0, %v1062_v2 }
 0x23f   : > { %v1177_v4 = vpop.permute.xlu1 %1176  ;;  %v608_v5 = vpop.permute.xlu0 %607 }
 0x240   : > { %1199 = vst.msk [vmem:[%s1982_s11 + $0xe] sm:$0x1] %vm507_vm0, %v1177_v4  ;;  %627 = vst.msk [vmem:[%s1982_s11 + $0x21] sm:$0x1] %vm507_vm0, %v608_v5 }
 0x243   : > { %v1327_v6 = vpop.permute.xlu1 %1326  ;;  %v719_v7 = vpop.permute.xlu0 %718 }
 0x244   : > { %740 = vst.msk [vmem:[%s1982_s11 + $0x12] sm:$0x1] %vm507_vm0, %v719_v7 }
 0x247   : > { %v1343_v8 = vpop.permute.xlu1 %1342  ;;  %v723_v9 = vpop.permute.xlu0 %722 }
 0x248   : > { %742 = vst.msk [vmem:[%s1982_s11 + $0x22] sm:$0x1] %vm507_vm0, %v723_v9 }
 0x24b   : > { %v606_v10 = vpop.permute.xlu1 %605  ;;  %v834_v11 = vpop.permute.xlu0 %833 }
 0x24c   : > { %626 = vst.msk [vmem:[%s1982_s11 + $0x19] sm:$0x1] %vm507_vm0, %v606_v10  ;;  %855 = vst.msk [vmem:[%s1982_s11 + $0x13] sm:$0x1] %vm507_vm0, %v834_v11 }
 0x24f   : > { %v838_v12 = vpop.permute.xlu0 %837  ;;  %v610_v13 = vpop.permute.xlu1 %609 }
 0x250   : > { %857 = vst.msk [vmem:[%s1982_s11 + $0x23] sm:$0x1] %vm507_vm0, %v838_v12  ;;  %628 = vst.msk [vmem:[%s1982_s11 + $0x29] sm:$0x1] %vm507_vm0, %v610_v13 }
 0x253   : > { %v949_v14 = vpop.permute.xlu0 %948  ;;  %v721_v15 = vpop.permute.xlu1 %720 }
 0x254   : > { %970 = vst.msk [vmem:[%s1982_s11 + $0x14] sm:$0x1] %vm507_vm0, %v949_v14  ;;  %741 = vst.msk [vmem:[%s1982_s11 + $0x1a] sm:$0x1] %vm507_vm0, %v721_v15 }
 0x257   : > { %v953_v16 = vpop.permute.xlu0 %952  ;;  %v725_v17 = vpop.permute.xlu1 %724 }
 0x258   : > { %972 = vst.msk [vmem:[%s1982_s11 + $0x24] sm:$0x1] %vm507_vm0, %v953_v16  ;;  %743 = vst.msk [vmem:[%s1982_s11 + $0x2a] sm:$0x1] %vm507_vm0, %v725_v17 }
 0x25b   : > { %v1064_v18 = vpop.permute.xlu0 %1063  ;;  %v836_v19 = vpop.permute.xlu1 %835 }
 0x25c   : > { %1085 = vst.msk [vmem:[%s1982_s11 + $0x15] sm:$0x1] %vm507_vm0, %v1064_v18  ;;  %856 = vst.msk [vmem:[%s1982_s11 + $0x1b] sm:$0x1] %vm507_vm0, %v836_v19 }
 0x25f   : > { %v1068_v20 = vpop.permute.xlu0 %1067  ;;  %v840_v21 = vpop.permute.xlu1 %839 }
 0x260   : > { %1087 = vst.msk [vmem:[%s1982_s11 + $0x25] sm:$0x1] %vm507_vm0, %v1068_v20  ;;  %858 = vst.msk [vmem:[%s1982_s11 + $0x2b] sm:$0x1] %vm507_vm0, %v840_v21 }
 0x263   : > { %v1179_v22 = vpop.permute.xlu0 %1178  ;;  %v951_v23 = vpop.permute.xlu1 %950 }
 0x264   : > { %1200 = vst.msk [vmem:[%s1982_s11 + $0x16] sm:$0x1] %vm507_vm0, %v1179_v22  ;;  %971 = vst.msk [vmem:[%s1982_s11 + $0x1c] sm:$0x1] %vm507_vm0, %v951_v23 }
 0x267   : > { %v1183_v24 = vpop.permute.xlu0 %1182  ;;  %v955_v25 = vpop.permute.xlu1 %954 }
 0x268   : > { %1202 = vst.msk [vmem:[%s1982_s11 + $0x26] sm:$0x1] %vm507_vm0, %v1183_v24  ;;  %973 = vst.msk [vmem:[%s1982_s11 + $0x2c] sm:$0x1] %vm507_vm0, %v955_v25 }
 0x26b   : > { %v1325_v26 = vpop.permute.xlu0 %1324  ;;  %v1066_v27 = vpop.permute.xlu1 %1065 }
 0x26c   : > { %v1357_v28 = vsel %vm1356_vm1, %v1325_v26, %v1327_v6  ;;  %1086 = vst.msk [vmem:[%s1982_s11 + $0x1d] sm:$0x1] %vm507_vm0, %v1066_v27 }
 0x26d   : > { %1373 = vst.msk [vmem:[%s1982_s11 + $0x7] sm:$0x1] %vm507_vm0, %v1357_v28 }
 0x26f   : > { %v1341_v29 = vpop.permute.xlu0 %1340  ;;  %v1070_v3 = vpop.permute.xlu1 %1069 }
 0x270   : > { %v1361_v30 = vsel %vm1356_vm1, %v1341_v29, %v1343_v8  ;;  %1088 = vst.msk [vmem:[%s1982_s11 + $0x2d] sm:$0x1] %vm507_vm0, %v1070_v3 }
 0x271   : > { %1377 = vst.msk [vmem:[%s1982_s11 + $0x27] sm:$0x1] %vm507_vm0, %v1361_v30 }
 0x273   : > { %v612_v31 = vpop.permute.xlu0 %611  ;;  %v1181_v32 = vpop.permute.xlu1 %1180 }
 0x274   : > { %629 = vst.msk [vmem:[%s1982_s11 + $0x31] sm:$0x1] %vm507_vm0, %v612_v31  ;;  %1201 = vst.msk [vmem:[%s1982_s11 + $0x1e] sm:$0x1] %vm507_vm0, %v1181_v32 }
 0x277   : > { %v727_v33 = vpop.permute.xlu0 %726  ;;  %v1185_v34 = vpop.permute.xlu1 %1184 }
 0x278   : > { %744 = vst.msk [vmem:[%s1982_s11 + $0x32] sm:$0x1] %vm507_vm0, %v727_v33  ;;  %1203 = vst.msk [vmem:[%s1982_s11 + $0x2e] sm:$0x1] %vm507_vm0, %v1185_v34 }
 0x27b   : > { %v842_v35 = vpop.permute.xlu0 %841  ;;  %v1331_v36 = vpop.permute.xlu1 %1330 }
 0x27c   : > { %859 = vst.msk [vmem:[%s1982_s11 + $0x33] sm:$0x1] %vm507_vm0, %v842_v35 }
 0x27f   : > { %v957_v37 = vpop.permute.xlu0 %956  ;;  %v1335_v38 = vpop.permute.xlu1 %1334 }
 0x280   : > { %974 = vst.msk [vmem:[%s1982_s11 + $0x34] sm:$0x1] %vm507_vm0, %v957_v37 }
 0x283   : > { %v1072_v39 = vpop.permute.xlu0 %1071  ;;  %v1347_v40 = vpop.permute.xlu1 %1346 }
 0x284   : > { %1089 = vst.msk [vmem:[%s1982_s11 + $0x35] sm:$0x1] %vm507_vm0, %v1072_v39 }
 0x287   : > { %v1329_v41 = vpop.permute.xlu0 %1328  ;;  %v1351_v42 = vpop.permute.xlu1 %1350 }
 0x288   : > { %v1358_v43 = vsel %vm1356_vm1, %v1329_v41, %v1331_v36 }
 0x289   : > { %1374 = vst.msk [vmem:[%s1982_s11 + $0xf] sm:$0x1] %vm507_vm0, %v1358_v43 }
 0x28b   : > { %v1333_v44 = vpop.permute.xlu0 %1332  ;;  %v614_v45 = vpop.permute.xlu1 %613 }
 0x28c   : > { %v1359_v46 = vsel %vm1356_vm1, %v1333_v44, %v1335_v38  ;;  %630 = vst.msk [vmem:[%s1982_s11 + $0x39] sm:$0x1] %vm507_vm0, %v614_v45 }
 0x28d   : > { %1375 = vst.msk [vmem:[%s1982_s11 + $0x17] sm:$0x1] %vm507_vm0, %v1359_v46 }
 0x28f   : > { %v1345_v47 = vpop.permute.xlu0 %1344  ;;  %v729_v48 = vpop.permute.xlu1 %728 }
 0x290   : > { %v1362_v49 = vsel %vm1356_vm1, %v1345_v47, %v1347_v40  ;;  %745 = vst.msk [vmem:[%s1982_s11 + $0x3a] sm:$0x1] %vm507_vm0, %v729_v48 }
 0x291   : > { %1378 = vst.msk [vmem:[%s1982_s11 + $0x2f] sm:$0x1] %vm507_vm0, %v1362_v49 }
 0x293   : > { %v1349_v50 = vpop.permute.xlu0 %1348  ;;  %v844_v51 = vpop.permute.xlu1 %843 }
 0x294   : > { %v1363_v52 = vsel %vm1356_vm1, %v1349_v50, %v1351_v42  ;;  %860 = vst.msk [vmem:[%s1982_s11 + $0x3b] sm:$0x1] %vm507_vm0, %v844_v51 }
 0x295   : > { %1379 = vst.msk [vmem:[%s1982_s11 + $0x37] sm:$0x1] %vm507_vm0, %v1363_v52 }
 0x297   : > { %v1337_v53 = vpop.permute.xlu0 %1336  ;;  %v959_v54 = vpop.permute.xlu1 %958 }
 0x298   : > { %975 = vst.msk [vmem:[%s1982_s11 + $0x3c] sm:$0x1] %vm507_vm0, %v959_v54 }
 0x29b   : > { %v1353_v55 = vpop.permute.xlu0 %1352  ;;  %v1074_v56 = vpop.permute.xlu1 %1073 }
 0x29c   : > { %1090 = vst.msk [vmem:[%s1982_s11 + $0x3d] sm:$0x1] %vm507_vm0, %v1074_v56 }
 0x29f   : > { %v1187_v57 = vpop.permute.xlu0 %1186  ;;  %v1339_v58 = vpop.permute.xlu1 %1338 }
 0x2a0   : > { %1204 = vst.msk [vmem:[%s1982_s11 + $0x36] sm:$0x1] %vm507_vm0, %v1187_v57  ;;  %v1360_v59 = vsel %vm1356_vm1, %v1337_v53, %v1339_v58 }
 0x2a1   : > { %1376 = vst.msk [vmem:[%s1982_s11 + $0x1f] sm:$0x1] %vm507_vm0, %v1360_v59 }
 0x2a3   : > { %v1355_v60 = vpop.permute.xlu1 %1354 }
 0x2a4   : > { %v1364_v61 = vsel %vm1356_vm1, %v1353_v55, %v1355_v60 }
 0x2a5   : > { %1380 = vst.msk [vmem:[%s1982_s11 + $0x3f] sm:$0x1] %vm507_vm0, %v1364_v61 }
 0x2a7   : > { %v1189_v62 = vpop.permute.xlu1 %1188 }
 0x2a8   : > { %1205 = vst.msk [vmem:[%s1982_s11 + $0x3e] sm:$0x1] %vm507_vm0, %v1189_v62 }
 0x2a9   : > { %1667 = shalt.err (!%p1664_p5)
}
 0x2aa   : > { %s1668_s11 = scalar_lea.hbm %s2297_s9, 1024  ;;  %s1672_s25 = scalar_lea.hbm %s2356_s3, 4096 }
 0x2ab   : > { %p1669_p7 = scmp.ne.s32.totalorder %s2297_s9, %s1668_s11  ;;  %p1673_p1 = scmp.lt.u32.totalorder %s2297_s9, %s2356_s3 }
 0x2ac   : > { %p1674_p2 = scmp.lt.u32.totalorder %s1672_s25, %s1668_s11  ;;  %p1676_p8 = scmp.lt.u32.totalorder %s1668_s11, %s2297_s9 }
 0x2ad   : > { %p1670_p10 = pnand %p1669_p7, %p2369_p9 }
 0x2ae   : > { %p1675_p3 = por %p1674_p2, %p1673_p1 }
 0x2af   : > { %p1671_p11 = pneg %p1670_p10 }
 0x2b0   : > { %p1677_p12 = por %p1676_p8, %p1675_p3 }
 0x2b2   : > { %p1678_p0 = pnand %p1677_p12, %p1671_p11 }
 0x2b4   : > { %1681 = shalt.err (!%p1678_p0)
}
 0x2b5   : > { %s1772_s15 = smov 128   ;;  %s1773_s16 = smov 256  }
 0x2b6   : > { %s1774_s20 = smov 8  }
 0x2b7   : > { %1516 = dma.vmem_to_hbm [thread:$0]  (%p2369_p9), %s2290_s30, 1024, %s2297_s9, %s1382_s10, %s1772_s15, %s1773_s16, %s1774_s20  }
 0x2b8 PF: > { %p1527_p6 = scmp.ge.s32.totalorder %s1752_s19, 2  ;;  %s1411_s27 = sand.u32 1, %s1724_s12  }
 0x2b9   : > { %p2370_p13 = scmp.ne.s32.totalorder %s2361_s4, 0  ;;  %s1412_s24 = scalar_lea.sflag [#allocation6], %s1411_s27 }
 0x2bb   : > { %p1523_p4 = pnand %p1527_p6, %p2370_p13 }
 0x2bd   : > { %1719 = dma.done.wait (!%p1523_p4), %s1412_s24, 1024  }
 0x2be   : > { %1721 = vsyncadd (!%p1523_p4), %s1412_s24, 4294966272  ;;  %s19_s19 = sadd.s32 1, %s1752_s19   ;;  %s2371_s12 = smov %s1728_s13 }
 0x2bf   : > { %p16_p5 = scmp.ge.s32.totalorder %s19_s19, 6   ;;  %s2372_s13 = smov %s1732_s14 }
 0x2c0   : > { %s2373_s14 = smov %s1873_s6  ;;  %s2374_s15 = smov %s1744_s17 }
 0x2c1   : > { %s2375_s16 = smov %s1748_s18  ;;  %s2376_s17 = smov %s2379_s22 }
 0x2c2   : > { %s2377_s18 = smov %s2383_s23  ;;  %18 = sbr.rel (!%p16_p5) target bundleno = 7 (0x7), region = 77 }
 0x2c9   :  { %1417 = vsyncpa [#allocation5], 1 }
 0x2ca   :  { %1419 = vsyncpa [#allocation5 + $0x1], 1 }
 0x2cb   :  { %1420 = vsyncpa [#allocation6], 1 }
 0x2cc   :  { %1422 = vsyncpa [#allocation6 + $0x1], 1 }

</bundles_post_ra>
